<compile_context>
chip_gen: v5e
topology: v5e:2x2
jax: 0.10.0
libtpu: 0.0.40
codegen_flags: <defaults>
</compile_context>

<pallas_src>
import numpy as np
import jax
import jax.numpy as jnp
from jax.experimental import pallas as pl
from jax.experimental.pallas import tpu as pltpu


def _round_up(x, m):
    return (x + m - 1) // m * m


def _make_opn_mat_kernel(tn):
    """tn = number of pairs handled per grid step (small, statically unrolled)."""

    def _kernel(row_ref, col_ref, x_ref, w_ref, o_ref):
        # row_ref/col_ref: (N_pad,) int32 in SMEM (scalar prefetch)
        # x_ref: (F, D, TB)   x[b, f, d] laid out as [f, d, b]  (batch on lanes)
        # w_ref: (TN, D, D)   w[n, e, d] == kernel[e, n, d]     (pre-transposed)
        # o_ref: (TN, TB)     out[n, b]
        n0 = pl.program_id(1) * tn
        for t in range(tn):  # small static unroll (<= TN pairs)
            r = row_ref[n0 + t]
            c = col_ref[n0 + t]
            p_t = x_ref[r]                     # (D_d, TB)
            q_t = x_ref[c]                     # (D_e, TB)
            w_t = w_ref[t]                     # (D_e, D_d)
            # kp[e, b] = sum_d kernel[e, n, d] * x[b, row[n], d]   (MXU)
            kp = jnp.dot(w_t, p_t, preferred_element_type=jnp.float32)  # (D_e, TB)
            # out[n, b] = sum_e kp[e, b] * x[b, col[n], e]  (sublane reduce -> lane-dense row)
            val = jnp.sum(kp * q_t.astype(jnp.float32), axis=0, keepdims=True)  # (1, TB)
            o_ref[pl.ds(t, 1), :] = val.astype(o_ref.dtype)

    return _kernel


def outer_product_network_mat(x, kernel):
    """x: (B, F, D) float32; kernel: (D, num_ix, D) float32 -> (B, num_ix)."""
    B, F, D = x.shape
    row, col = [], []
    for i in range(F - 1):
        for j in range(i + 1, F):
            row.append(i)
            col.append(j)
    N = len(row)
    assert kernel.shape == (D, N, D)

    # ---- tile sizes -------------------------------------------------------
    if B <= 256:
        TB = _round_up(max(B, 1), 8)       # single batch tile, full (legal block)
        B_pad = TB
    else:
        TB = 256                           # multiple of 128 -> lane-dense blocks
        B_pad = _round_up(B, TB)

    TN = 8 if N <= 64 else 32              # pairs per grid step (multiple of 8)
    N_pad = _round_up(N, TN)

    n_batch_tiles = B_pad // TB
    n_pair_tiles = N_pad // TN

    # ---- host-side layout prep (one-time, cheap) --------------------------
    row_arr = np.zeros((N_pad,), dtype=np.int32)
    col_arr = np.zeros((N_pad,), dtype=np.int32)
    row_arr[:N] = np.asarray(row, dtype=np.int32)
    col_arr[:N] = np.asarray(col, dtype=np.int32)
    row_arr = jnp.asarray(row_arr)
    col_arr = jnp.asarray(col_arr)

    # x -> (F, D, B_pad): field on the leading (dynamically indexable) axis,
    # batch on lanes.
    x2 = jnp.transpose(x, (1, 2, 0))
    if B_pad != B:
        x2 = jnp.pad(x2, ((0, 0), (0, 0), (0, B_pad - B)))

    # kernel (D_e, N, D_d) -> (N_pad, D_e, D_d): no in-kernel transpose needed.
    w2 = jnp.transpose(kernel, (1, 0, 2))
    if N_pad != N:
        w2 = jnp.pad(w2, ((0, N_pad - N), (0, 0), (0, 0)))

    # ---- pallas call ------------------------------------------------------
    flops = (2 * D * D + 2 * D) * B_pad * N_pad
    bytes_accessed = 4 * (F * D * B_pad + N_pad * D * D + N_pad * B_pad)

    out_padded = pl.pallas_call(
        _make_opn_mat_kernel(TN),
        out_shape=jax.ShapeDtypeStruct((N_pad, B_pad), jnp.float32),
        grid_spec=pltpu.PrefetchScalarGridSpec(
            num_scalar_prefetch=2,
            grid=(n_batch_tiles, n_pair_tiles),
            in_specs=[
                # x tile stays resident across the (inner) pair axis.
                pl.BlockSpec((F, D, TB), lambda i, j, row_r, col_r: (0, 0, i)),
                pl.BlockSpec((TN, D, D), lambda i, j, row_r, col_r: (j, 0, 0)),
            ],
            out_specs=pl.BlockSpec((TN, TB), lambda i, j, row_r, col_r: (j, i)),
        ),
        compiler_params=pltpu.CompilerParams(
            dimension_semantics=("parallel", "arbitrary"),
            vmem_limit_bytes=48 * 1024 * 1024,
        ),
        cost_estimate=pl.CostEstimate(
            flops=int(flops), transcendentals=0, bytes_accessed=int(bytes_accessed)
        ),
    )(row_arr, col_arr, x2, w2)

    # (N_pad, B_pad) -> (B, N)
    return out_padded[:N, :B].T


def _reference(x, kernel):
    """Pure-JAX transliteration of the PyTorch forward (kernel_type='mat')."""
    B, F, D = x.shape
    row, col = [], []
    for i in range(F - 1):
        for j in range(i + 1, F):
            row.append(i)
            col.append(j)
    p = x[:, jnp.array(row), :]                               # (B, N, D)
    q = x[:, jnp.array(col), :]                               # (B, N, D)
    kp = jnp.sum(p[:, None, :, :] * kernel[None], axis=-1)    # (B, D, N)
    kp = jnp.transpose(kp, (0, 2, 1))                         # (B, N, D)
    return jnp.sum(kp * q, axis=-1)                           # (B, N)


if __name__ == "__main__":
    B, F, D = 2, 4, 32
    num_ix = F * (F - 1) // 2

    key = jax.random.PRNGKey(0)
    kx, kw = jax.random.split(key)

    x = jax.random.normal(kx, (B, F, D), dtype=jnp.float32)

    # xavier_uniform_ on shape (D, num_ix, D):
    # fan_in = num_ix * D, fan_out = D * D (PyTorch's >2-D fan convention)
    fan_in = num_ix * D
    fan_out = D * D
    bound = float(np.sqrt(6.0 / (fan_in + fan_out)))
    kernel = jax.random.uniform(
        kw, (D, num_ix, D), dtype=jnp.float32, minval=-bound, maxval=bound
    )

    out = outer_product_network_mat(x, kernel)
    out = jax.block_until_ready(out)

    ref = _reference(x, kernel)
    assert out.shape == (B, num_ix)
    np.testing.assert_allclose(np.asarray(out), np.asarray(ref), rtol=1e-5, atol=1e-5)

    print("KERNEL_OK")
</pallas_src>

<mosaic_0001>
module attributes {stable_mosaic.version = 11 : i64} {
  func.func @_kernel(%arg0: i32, %arg1: i32, %arg2: memref<8xi32, #tpu.memory_space<smem>>, %arg3: memref<8xi32, #tpu.memory_space<smem>>, %arg4: memref<4x32x8xf32, #tpu.memory_space<vmem>>, %arg5: memref<8x32x32xf32, #tpu.memory_space<vmem>>, %arg6: memref<8x8xf32, #tpu.memory_space<vmem>>) attributes {dimension_semantics = [#tpu.dimension_semantics<parallel>, #tpu.dimension_semantics<arbitrary>], iteration_bounds = array<i64: 1, 1>, scalar_prefetch = 2 : i64, scratch_operands = 0 : i64, tpu.core_type = #tpu.core_type<tc>, window_params = [{transform_indices = @transform_0, window_bounds = array<i64: 4, 32, 8>}, {transform_indices = @transform_1, window_bounds = array<i64: 8, 32, 32>}, {transform_indices = @transform_2, window_bounds = array<i64: 8, 8>}]} {
    %c8_i32 = arith.constant 8 : i32
    %0 = arith.muli %arg1, %c8_i32 : i32
    %c0_i32 = arith.constant 0 : i32
    %1 = arith.addi %0, %c0_i32 : i32
    %2 = arith.index_cast %1 : i32 to index
    %3 = memref.load %arg2[%2] : memref<8xi32, #tpu.memory_space<smem>>
    %c0_i32_0 = arith.constant 0 : i32
    %4 = arith.addi %0, %c0_i32_0 : i32
    %5 = arith.index_cast %4 : i32 to index
    %6 = memref.load %arg3[%5] : memref<8xi32, #tpu.memory_space<smem>>
    %7 = arith.index_cast %3 : i32 to index
    %c0 = arith.constant 0 : index
    %c0_1 = arith.constant 0 : index
    %8 = vector.load %arg4[%7, %c0, %c0_1] : memref<4x32x8xf32, #tpu.memory_space<vmem>>, vector<1x32x8xf32>
    %9 = vector.shape_cast %8 : vector<1x32x8xf32> to vector<32x8xf32>
    %10 = arith.index_cast %6 : i32 to index
    %c0_2 = arith.constant 0 : index
    %c0_3 = arith.constant 0 : index
    %11 = vector.load %arg4[%10, %c0_2, %c0_3] : memref<4x32x8xf32, #tpu.memory_space<vmem>>, vector<1x32x8xf32>
    %12 = vector.shape_cast %11 : vector<1x32x8xf32> to vector<32x8xf32>
    %c0_4 = arith.constant 0 : index
    %c0_5 = arith.constant 0 : index
    %c0_6 = arith.constant 0 : index
    %13 = vector.load %arg5[%c0_4, %c0_5, %c0_6] : memref<8x32x32xf32, #tpu.memory_space<vmem>>, vector<1x32x32xf32>
    %14 = vector.shape_cast %13 : vector<1x32x32xf32> to vector<32x32xf32>
    %cst = arith.constant dense<0.000000e+00> : vector<32x8xf32>
    %15 = tpu.matmul %14, %9, %cst {dimension_numbers = #tpu.dot_dimension_numbers<[1], [0], [0], [1], [0, 0, 1, 1], [], []>} : vector<32x32xf32>, vector<32x8xf32>, vector<32x8xf32> -> vector<32x8xf32>
    %16 = arith.mulf %15, %12 : vector<32x8xf32>
    %cst_7 = arith.constant dense<0.000000e+00> : vector<8xf32>
    %17 = vector.multi_reduction <add>, %16, %cst_7 [0] : vector<32x8xf32> to vector<8xf32>
    %18 = vector.shape_cast %17 : vector<8xf32> to vector<1x8xf32>
    %c0_8 = arith.constant 0 : index
    %c0_9 = arith.constant 0 : index
    %19 = vector.load %arg6[%c0_8, %c0_9] : memref<8x8xf32, #tpu.memory_space<vmem>>, vector<1x8xf32>
    tpu.vector_store %arg6[%c0_8, %c0_9], %18 {strides = array<i32>} : memref<8x8xf32, #tpu.memory_space<vmem>>, vector<1x8xf32>,
    %c1_i32 = arith.constant 1 : i32
    %20 = arith.addi %0, %c1_i32 : i32
    %21 = arith.index_cast %20 : i32 to index
    %22 = memref.load %arg2[%21] : memref<8xi32, #tpu.memory_space<smem>>
    %c1_i32_10 = arith.constant 1 : i32
    %23 = arith.addi %0, %c1_i32_10 : i32
    %24 = arith.index_cast %23 : i32 to index
    %25 = memref.load %arg3[%24] : memref<8xi32, #tpu.memory_space<smem>>
    %26 = arith.index_cast %22 : i32 to index
    %c0_11 = arith.constant 0 : index
    %c0_12 = arith.constant 0 : index
    %27 = vector.load %arg4[%26, %c0_11, %c0_12] : memref<4x32x8xf32, #tpu.memory_space<vmem>>, vector<1x32x8xf32>
    %28 = vector.shape_cast %27 : vector<1x32x8xf32> to vector<32x8xf32>
    %29 = arith.index_cast %25 : i32 to index
    %c0_13 = arith.constant 0 : index
    %c0_14 = arith.constant 0 : index
    %30 = vector.load %arg4[%29, %c0_13, %c0_14] : memref<4x32x8xf32, #tpu.memory_space<vmem>>, vector<1x32x8xf32>
    %31 = vector.shape_cast %30 : vector<1x32x8xf32> to vector<32x8xf32>
    %c1 = arith.constant 1 : index
    %c0_15 = arith.constant 0 : index
    %c0_16 = arith.constant 0 : index
    %32 = vector.load %arg5[%c1, %c0_15, %c0_16] : memref<8x32x32xf32, #tpu.memory_space<vmem>>, vector<1x32x32xf32>
    %33 = vector.shape_cast %32 : vector<1x32x32xf32> to vector<32x32xf32>
    %cst_17 = arith.constant dense<0.000000e+00> : vector<32x8xf32>
    %34 = tpu.matmul %33, %28, %cst_17 {dimension_numbers = #tpu.dot_dimension_numbers<[1], [0], [0], [1], [0, 0, 1, 1], [], []>} : vector<32x32xf32>, vector<32x8xf32>, vector<32x8xf32> -> vector<32x8xf32>
    %35 = arith.mulf %34, %31 : vector<32x8xf32>
    %cst_18 = arith.constant dense<0.000000e+00> : vector<8xf32>
    %36 = vector.multi_reduction <add>, %35, %cst_18 [0] : vector<32x8xf32> to vector<8xf32>
    %37 = vector.shape_cast %36 : vector<8xf32> to vector<1x8xf32>
    %c1_19 = arith.constant 1 : index
    %c0_20 = arith.constant 0 : index
    %38 = vector.load %arg6[%c1_19, %c0_20] : memref<8x8xf32, #tpu.memory_space<vmem>>, vector<1x8xf32>
    tpu.vector_store %arg6[%c1_19, %c0_20], %37 {strides = array<i32>} : memref<8x8xf32, #tpu.memory_space<vmem>>, vector<1x8xf32>,
    %c2_i32 = arith.constant 2 : i32
    %39 = arith.addi %0, %c2_i32 : i32
    %40 = arith.index_cast %39 : i32 to index
    %41 = memref.load %arg2[%40] : memref<8xi32, #tpu.memory_space<smem>>
    %c2_i32_21 = arith.constant 2 : i32
    %42 = arith.addi %0, %c2_i32_21 : i32
    %43 = arith.index_cast %42 : i32 to index
    %44 = memref.load %arg3[%43] : memref<8xi32, #tpu.memory_space<smem>>
    %45 = arith.index_cast %41 : i32 to index
    %c0_22 = arith.constant 0 : index
    %c0_23 = arith.constant 0 : index
    %46 = vector.load %arg4[%45, %c0_22, %c0_23] : memref<4x32x8xf32, #tpu.memory_space<vmem>>, vector<1x32x8xf32>
    %47 = vector.shape_cast %46 : vector<1x32x8xf32> to vector<32x8xf32>
    %48 = arith.index_cast %44 : i32 to index
    %c0_24 = arith.constant 0 : index
    %c0_25 = arith.constant 0 : index
    %49 = vector.load %arg4[%48, %c0_24, %c0_25] : memref<4x32x8xf32, #tpu.memory_space<vmem>>, vector<1x32x8xf32>
    %50 = vector.shape_cast %49 : vector<1x32x8xf32> to vector<32x8xf32>
    %c2 = arith.constant 2 : index
    %c0_26 = arith.constant 0 : index
    %c0_27 = arith.constant 0 : index
    %51 = vector.load %arg5[%c2, %c0_26, %c0_27] : memref<8x32x32xf32, #tpu.memory_space<vmem>>, vector<1x32x32xf32>
    %52 = vector.shape_cast %51 : vector<1x32x32xf32> to vector<32x32xf32>
    %cst_28 = arith.constant dense<0.000000e+00> : vector<32x8xf32>
    %53 = tpu.matmul %52, %47, %cst_28 {dimension_numbers = #tpu.dot_dimension_numbers<[1], [0], [0], [1], [0, 0, 1, 1], [], []>} : vector<32x32xf32>, vector<32x8xf32>, vector<32x8xf32> -> vector<32x8xf32>
    %54 = arith.mulf %53, %50 : vector<32x8xf32>
    %cst_29 = arith.constant dense<0.000000e+00> : vector<8xf32>
    %55 = vector.multi_reduction <add>, %54, %cst_29 [0] : vector<32x8xf32> to vector<8xf32>
    %56 = vector.shape_cast %55 : vector<8xf32> to vector<1x8xf32>
    %c2_30 = arith.constant 2 : index
    %c0_31 = arith.constant 0 : index
    %57 = vector.load %arg6[%c2_30, %c0_31] : memref<8x8xf32, #tpu.memory_space<vmem>>, vector<1x8xf32>
    tpu.vector_store %arg6[%c2_30, %c0_31], %56 {strides = array<i32>} : memref<8x8xf32, #tpu.memory_space<vmem>>, vector<1x8xf32>,
    %c3_i32 = arith.constant 3 : i32
    %58 = arith.addi %0, %c3_i32 : i32
    %59 = arith.index_cast %58 : i32 to index
    %60 = memref.load %arg2[%59] : memref<8xi32, #tpu.memory_space<smem>>
    %c3_i32_32 = arith.constant 3 : i32
    %61 = arith.addi %0, %c3_i32_32 : i32
    %62 = arith.index_cast %61 : i32 to index
    %63 = memref.load %arg3[%62] : memref<8xi32, #tpu.memory_space<smem>>
    %64 = arith.index_cast %60 : i32 to index
    %c0_33 = arith.constant 0 : index
    %c0_34 = arith.constant 0 : index
    %65 = vector.load %arg4[%64, %c0_33, %c0_34] : memref<4x32x8xf32, #tpu.memory_space<vmem>>, vector<1x32x8xf32>
    %66 = vector.shape_cast %65 : vector<1x32x8xf32> to vector<32x8xf32>
    %67 = arith.index_cast %63 : i32 to index
    %c0_35 = arith.constant 0 : index
    %c0_36 = arith.constant 0 : index
    %68 = vector.load %arg4[%67, %c0_35, %c0_36] : memref<4x32x8xf32, #tpu.memory_space<vmem>>, vector<1x32x8xf32>
    %69 = vector.shape_cast %68 : vector<1x32x8xf32> to vector<32x8xf32>
    %c3 = arith.constant 3 : index
    %c0_37 = arith.constant 0 : index
    %c0_38 = arith.constant 0 : index
    %70 = vector.load %arg5[%c3, %c0_37, %c0_38] : memref<8x32x32xf32, #tpu.memory_space<vmem>>, vector<1x32x32xf32>
    %71 = vector.shape_cast %70 : vector<1x32x32xf32> to vector<32x32xf32>
    %cst_39 = arith.constant dense<0.000000e+00> : vector<32x8xf32>
    %72 = tpu.matmul %71, %66, %cst_39 {dimension_numbers = #tpu.dot_dimension_numbers<[1], [0], [0], [1], [0, 0, 1, 1], [], []>} : vector<32x32xf32>, vector<32x8xf32>, vector<32x8xf32> -> vector<32x8xf32>
    %73 = arith.mulf %72, %69 : vector<32x8xf32>
    %cst_40 = arith.constant dense<0.000000e+00> : vector<8xf32>
    %74 = vector.multi_reduction <add>, %73, %cst_40 [0] : vector<32x8xf32> to vector<8xf32>
    %75 = vector.shape_cast %74 : vector<8xf32> to vector<1x8xf32>
    %c3_41 = arith.constant 3 : index
    %c0_42 = arith.constant 0 : index
    %76 = vector.load %arg6[%c3_41, %c0_42] : memref<8x8xf32, #tpu.memory_space<vmem>>, vector<1x8xf32>
    tpu.vector_store %arg6[%c3_41, %c0_42], %75 {strides = array<i32>} : memref<8x8xf32, #tpu.memory_space<vmem>>, vector<1x8xf32>,
    %c4_i32 = arith.constant 4 : i32
    %77 = arith.addi %0, %c4_i32 : i32
    %78 = arith.index_cast %77 : i32 to index
    %79 = memref.load %arg2[%78] : memref<8xi32, #tpu.memory_space<smem>>
    %c4_i32_43 = arith.constant 4 : i32
    %80 = arith.addi %0, %c4_i32_43 : i32
    %81 = arith.index_cast %80 : i32 to index
    %82 = memref.load %arg3[%81] : memref<8xi32, #tpu.memory_space<smem>>
    %83 = arith.index_cast %79 : i32 to index
    %c0_44 = arith.constant 0 : index
    %c0_45 = arith.constant 0 : index
    %84 = vector.load %arg4[%83, %c0_44, %c0_45] : memref<4x32x8xf32, #tpu.memory_space<vmem>>, vector<1x32x8xf32>
    %85 = vector.shape_cast %84 : vector<1x32x8xf32> to vector<32x8xf32>
    %86 = arith.index_cast %82 : i32 to index
    %c0_46 = arith.constant 0 : index
    %c0_47 = arith.constant 0 : index
    %87 = vector.load %arg4[%86, %c0_46, %c0_47] : memref<4x32x8xf32, #tpu.memory_space<vmem>>, vector<1x32x8xf32>
    %88 = vector.shape_cast %87 : vector<1x32x8xf32> to vector<32x8xf32>
    %c4 = arith.constant 4 : index
    %c0_48 = arith.constant 0 : index
    %c0_49 = arith.constant 0 : index
    %89 = vector.load %arg5[%c4, %c0_48, %c0_49] : memref<8x32x32xf32, #tpu.memory_space<vmem>>, vector<1x32x32xf32>
    %90 = vector.shape_cast %89 : vector<1x32x32xf32> to vector<32x32xf32>
    %cst_50 = arith.constant dense<0.000000e+00> : vector<32x8xf32>
    %91 = tpu.matmul %90, %85, %cst_50 {dimension_numbers = #tpu.dot_dimension_numbers<[1], [0], [0], [1], [0, 0, 1, 1], [], []>} : vector<32x32xf32>, vector<32x8xf32>, vector<32x8xf32> -> vector<32x8xf32>
    %92 = arith.mulf %91, %88 : vector<32x8xf32>
    %cst_51 = arith.constant dense<0.000000e+00> : vector<8xf32>
    %93 = vector.multi_reduction <add>, %92, %cst_51 [0] : vector<32x8xf32> to vector<8xf32>
    %94 = vector.shape_cast %93 : vector<8xf32> to vector<1x8xf32>
    %c4_52 = arith.constant 4 : index
    %c0_53 = arith.constant 0 : index
    %95 = vector.load %arg6[%c4_52, %c0_53] : memref<8x8xf32, #tpu.memory_space<vmem>>, vector<1x8xf32>
    tpu.vector_store %arg6[%c4_52, %c0_53], %94 {strides = array<i32>} : memref<8x8xf32, #tpu.memory_space<vmem>>, vector<1x8xf32>,
    %c5_i32 = arith.constant 5 : i32
    %96 = arith.addi %0, %c5_i32 : i32
    %97 = arith.index_cast %96 : i32 to index
    %98 = memref.load %arg2[%97] : memref<8xi32, #tpu.memory_space<smem>>
    %c5_i32_54 = arith.constant 5 : i32
    %99 = arith.addi %0, %c5_i32_54 : i32
    %100 = arith.index_cast %99 : i32 to index
    %101 = memref.load %arg3[%100] : memref<8xi32, #tpu.memory_space<smem>>
    %102 = arith.index_cast %98 : i32 to index
    %c0_55 = arith.constant 0 : index
    %c0_56 = arith.constant 0 : index
    %103 = vector.load %arg4[%102, %c0_55, %c0_56] : memref<4x32x8xf32, #tpu.memory_space<vmem>>, vector<1x32x8xf32>
    %104 = vector.shape_cast %103 : vector<1x32x8xf32> to vector<32x8xf32>
    %105 = arith.index_cast %101 : i32 to index
    %c0_57 = arith.constant 0 : index
    %c0_58 = arith.constant 0 : index
    %106 = vector.load %arg4[%105, %c0_57, %c0_58] : memref<4x32x8xf32, #tpu.memory_space<vmem>>, vector<1x32x8xf32>
    %107 = vector.shape_cast %106 : vector<1x32x8xf32> to vector<32x8xf32>
    %c5 = arith.constant 5 : index
    %c0_59 = arith.constant 0 : index
    %c0_60 = arith.constant 0 : index
    %108 = vector.load %arg5[%c5, %c0_59, %c0_60] : memref<8x32x32xf32, #tpu.memory_space<vmem>>, vector<1x32x32xf32>
    %109 = vector.shape_cast %108 : vector<1x32x32xf32> to vector<32x32xf32>
    %cst_61 = arith.constant dense<0.000000e+00> : vector<32x8xf32>
    %110 = tpu.matmul %109, %104, %cst_61 {dimension_numbers = #tpu.dot_dimension_numbers<[1], [0], [0], [1], [0, 0, 1, 1], [], []>} : vector<32x32xf32>, vector<32x8xf32>, vector<32x8xf32> -> vector<32x8xf32>
    %111 = arith.mulf %110, %107 : vector<32x8xf32>
    %cst_62 = arith.constant dense<0.000000e+00> : vector<8xf32>
    %112 = vector.multi_reduction <add>, %111, %cst_62 [0] : vector<32x8xf32> to vector<8xf32>
    %113 = vector.shape_cast %112 : vector<8xf32> to vector<1x8xf32>
    %c5_63 = arith.constant 5 : index
    %c0_64 = arith.constant 0 : index
    %114 = vector.load %arg6[%c5_63, %c0_64] : memref<8x8xf32, #tpu.memory_space<vmem>>, vector<1x8xf32>
    tpu.vector_store %arg6[%c5_63, %c0_64], %113 {strides = array<i32>} : memref<8x8xf32, #tpu.memory_space<vmem>>, vector<1x8xf32>,
    %c6_i32 = arith.constant 6 : i32
    %115 = arith.addi %0, %c6_i32 : i32
    %116 = arith.index_cast %115 : i32 to index
    %117 = memref.load %arg2[%116] : memref<8xi32, #tpu.memory_space<smem>>
    %c6_i32_65 = arith.constant 6 : i32
    %118 = arith.addi %0, %c6_i32_65 : i32
    %119 = arith.index_cast %118 : i32 to index
    %120 = memref.load %arg3[%119] : memref<8xi32, #tpu.memory_space<smem>>
    %121 = arith.index_cast %117 : i32 to index
    %c0_66 = arith.constant 0 : index
    %c0_67 = arith.constant 0 : index
    %122 = vector.load %arg4[%121, %c0_66, %c0_67] : memref<4x32x8xf32, #tpu.memory_space<vmem>>, vector<1x32x8xf32>
    %123 = vector.shape_cast %122 : vector<1x32x8xf32> to vector<32x8xf32>
    %124 = arith.index_cast %120 : i32 to index
    %c0_68 = arith.constant 0 : index
    %c0_69 = arith.constant 0 : index
    %125 = vector.load %arg4[%124, %c0_68, %c0_69] : memref<4x32x8xf32, #tpu.memory_space<vmem>>, vector<1x32x8xf32>
    %126 = vector.shape_cast %125 : vector<1x32x8xf32> to vector<32x8xf32>
    %c6 = arith.constant 6 : index
    %c0_70 = arith.constant 0 : index
    %c0_71 = arith.constant 0 : index
    %127 = vector.load %arg5[%c6, %c0_70, %c0_71] : memref<8x32x32xf32, #tpu.memory_space<vmem>>, vector<1x32x32xf32>
    %128 = vector.shape_cast %127 : vector<1x32x32xf32> to vector<32x32xf32>
    %cst_72 = arith.constant dense<0.000000e+00> : vector<32x8xf32>
    %129 = tpu.matmul %128, %123, %cst_72 {dimension_numbers = #tpu.dot_dimension_numbers<[1], [0], [0], [1], [0, 0, 1, 1], [], []>} : vector<32x32xf32>, vector<32x8xf32>, vector<32x8xf32> -> vector<32x8xf32>
    %130 = arith.mulf %129, %126 : vector<32x8xf32>
    %cst_73 = arith.constant dense<0.000000e+00> : vector<8xf32>
    %131 = vector.multi_reduction <add>, %130, %cst_73 [0] : vector<32x8xf32> to vector<8xf32>
    %132 = vector.shape_cast %131 : vector<8xf32> to vector<1x8xf32>
    %c6_74 = arith.constant 6 : index
    %c0_75 = arith.constant 0 : index
    %133 = vector.load %arg6[%c6_74, %c0_75] : memref<8x8xf32, #tpu.memory_space<vmem>>, vector<1x8xf32>
    tpu.vector_store %arg6[%c6_74, %c0_75], %132 {strides = array<i32>} : memref<8x8xf32, #tpu.memory_space<vmem>>, vector<1x8xf32>,
    %c7_i32 = arith.constant 7 : i32
    %134 = arith.addi %0, %c7_i32 : i32
    %135 = arith.index_cast %134 : i32 to index
    %136 = memref.load %arg2[%135] : memref<8xi32, #tpu.memory_space<smem>>
    %c7_i32_76 = arith.constant 7 : i32
    %137 = arith.addi %0, %c7_i32_76 : i32
    %138 = arith.index_cast %137 : i32 to index
    %139 = memref.load %arg3[%138] : memref<8xi32, #tpu.memory_space<smem>>
    %140 = arith.index_cast %136 : i32 to index
    %c0_77 = arith.constant 0 : index
    %c0_78 = arith.constant 0 : index
    %141 = vector.load %arg4[%140, %c0_77, %c0_78] : memref<4x32x8xf32, #tpu.memory_space<vmem>>, vector<1x32x8xf32>
    %142 = vector.shape_cast %141 : vector<1x32x8xf32> to vector<32x8xf32>
    %143 = arith.index_cast %139 : i32 to index
    %c0_79 = arith.constant 0 : index
    %c0_80 = arith.constant 0 : index
    %144 = vector.load %arg4[%143, %c0_79, %c0_80] : memref<4x32x8xf32, #tpu.memory_space<vmem>>, vector<1x32x8xf32>
    %145 = vector.shape_cast %144 : vector<1x32x8xf32> to vector<32x8xf32>
    %c7 = arith.constant 7 : index
    %c0_81 = arith.constant 0 : index
    %c0_82 = arith.constant 0 : index
    %146 = vector.load %arg5[%c7, %c0_81, %c0_82] : memref<8x32x32xf32, #tpu.memory_space<vmem>>, vector<1x32x32xf32>
    %147 = vector.shape_cast %146 : vector<1x32x32xf32> to vector<32x32xf32>
    %cst_83 = arith.constant dense<0.000000e+00> : vector<32x8xf32>
    %148 = tpu.matmul %147, %142, %cst_83 {dimension_numbers = #tpu.dot_dimension_numbers<[1], [0], [0], [1], [0, 0, 1, 1], [], []>} : vector<32x32xf32>, vector<32x8xf32>, vector<32x8xf32> -> vector<32x8xf32>
    %149 = arith.mulf %148, %145 : vector<32x8xf32>
    %cst_84 = arith.constant dense<0.000000e+00> : vector<8xf32>
    %150 = vector.multi_reduction <add>, %149, %cst_84 [0] : vector<32x8xf32> to vector<8xf32>
    %151 = vector.shape_cast %150 : vector<8xf32> to vector<1x8xf32>
    %c7_85 = arith.constant 7 : index
    %c0_86 = arith.constant 0 : index
    %152 = vector.load %arg6[%c7_85, %c0_86] : memref<8x8xf32, #tpu.memory_space<vmem>>, vector<1x8xf32>
    tpu.vector_store %arg6[%c7_85, %c0_86], %151 {strides = array<i32>} : memref<8x8xf32, #tpu.memory_space<vmem>>, vector<1x8xf32>,
    return
  }
  func.func @transform_0(%arg0: i32, %arg1: i32, %arg2: memref<8xi32, #tpu.memory_space<smem>>, %arg3: memref<8xi32, #tpu.memory_space<smem>>) -> (i32, i32, i32) {
    %c0_i32 = arith.constant 0 : i32
    %c0_i32_0 = arith.constant 0 : i32
    %c0_i32_1 = arith.constant 0 : i32
    return %c0_i32, %c0_i32_0, %arg0 : i32, i32, i32
  }
  func.func @transform_1(%arg0: i32, %arg1: i32, %arg2: memref<8xi32, #tpu.memory_space<smem>>, %arg3: memref<8xi32, #tpu.memory_space<smem>>) -> (i32, i32, i32) {
    %c0_i32 = arith.constant 0 : i32
    %c0_i32_0 = arith.constant 0 : i32
    %c0_i32_1 = arith.constant 0 : i32
    return %arg1, %c0_i32, %c0_i32_0 : i32, i32, i32
  }
  func.func @transform_2(%arg0: i32, %arg1: i32, %arg2: memref<8xi32, #tpu.memory_space<smem>>, %arg3: memref<8xi32, #tpu.memory_space<smem>>) -> (i32, i32) {
    %c0_i32 = arith.constant 0 : i32
    return %arg1, %arg0 : i32, i32
  }
}

</mosaic_0001>

<bundles_post_ra>
// kernel: tpu_custom_call.1
= control target key start
LH: loop header
LB: loop body
LE: loop exit
PB: predicated region body
PF: predicated region fallthrough
CT: control target
= control target key end

     0   :  { %s872_s21 = smov [#allocation3]   ;;  %s873_s22 = smov [#allocation4]   ;;  %s1119_s0 = inlined_call_operand.vmem [shape: s32[8], index: 0, kind: input, shape index: {}]   ;;  %s1120_s2 = inlined_call_operand.vmem [shape: f32[4,32,8], index: 2, kind: input, shape index: {}]   ;;  %s1121_s3 = inlined_call_operand.hbm [shape: f32[8,32,32], index: 3, kind: input, shape index: {}]   ;;  %s1122_s4 = inlined_call_operand.hbm [shape: f32[8,8], index: 4, kind: output, shape index: {}]   ;;  %s1123_s1 = inlined_call_operand.vmem [shape: s32[8], index: 1, kind: input, shape index: {}]  }
   0x1   :  { %s10_s17 = sshll.u32 %s1119_s0, 4  ;;  %s15_s20 = sshll.u32 %s1123_s1, 4  ;;  %s11_s17 = int_to_ptr.vmem [resolvable:$true] %s10_s17  ;;  %s16_s20 = int_to_ptr.vmem [resolvable:$true] %s15_s20 }
   0x2   :  { %13 = dma.vmem_to_smem %s11_s17, 16, %s872_s21, [#allocation2] }
   0x3   :  { %18 = dma.vmem_to_smem %s16_s20, 16, %s873_s22, [#allocation2] }
   0x4   :  { %866 = dma.done.wait [#allocation2], 32 }
   0x5   :  { %867 = vsyncadd [#allocation2], 4294967264 }
   0x6   :  { %21 = sfence }
   0x7   :  { %22 = vsyncpa [#allocation6], 0 }
   0x8   :  { %23 = vsyncpa [#allocation7], 0  ;;  %s30_s25 = sshll.u32 %s1121_s3, 4  ;;  %s874_s0 = smov [#allocation5]   ;;  %s31_s25 = int_to_ptr.hbm [resolvable:$true] %s30_s25 }
   0x9   :  { %s32_s26 = sshll.u32 %s874_s0, 4  ;;  %s875_s1 = smov 128   ;;  %s33_s26 = int_to_ptr.vmem [resolvable:$true] %s32_s26 }
   0xa   :  { %s876_s27 = smov 8  }
   0xb   :  { %38 = dma.hbm_to_vmem [thread:$0]  %s31_s25, 4096, %s33_s26, [#allocation6], %s875_s1, %s875_s1, %s876_s27  }
   0xc   :  { %868 = dma.done.wait [#allocation6], 4096  }
   0xd   :  { %869 = vsyncadd [#allocation6], 4294963200  ;;  %s44_s28 = sld [smem:[#allocation3]]  ;;  %v58_v15 = vld [vmem:[#allocation5] sm:$0xff]  ;;  %vm62_vm0 = vcmask 261120   ;;  %v59_v29 = vld [vmem:[#allocation5 + $0x8] sm:$0xff] }
   0xe   :  { %s732_s29 = sld [smem:[#allocation3 + $0x1]]  ;;  %v140_v17 = vld [vmem:[#allocation5 + $0x20] sm:$0xff]  ;;  %v141_v31 = vld [vmem:[#allocation5 + $0x28] sm:$0xff]  ;;  %v60_v40 = vld [vmem:[#allocation5 + $0x10] sm:$0xff]  ;;  %vm108_vm1 = vcmask 64512   ;;  %vm122_vm2 = vcmask 57344  }
   0xf   :  { %s740_s30 = sld [smem:[#allocation3 + $0x2]]  ;;  %v219_v18 = vld [vmem:[#allocation5 + $0x40] sm:$0xff]  ;;  %v220_v33 = vld [vmem:[#allocation5 + $0x48] sm:$0xff]  ;;  %v142_v41 = vld [vmem:[#allocation5 + $0x30] sm:$0xff] }
  0x10   :  { %s748_s5 = sld [smem:[#allocation3 + $0x3]]  ;;  %v298_v19 = vld [vmem:[#allocation5 + $0x60] sm:$0xff]  ;;  %v299_v34 = vld [vmem:[#allocation5 + $0x68] sm:$0xff]  ;;  %v221_v42 = vld [vmem:[#allocation5 + $0x50] sm:$0xff] }
  0x11   :  { %s912_s6 = sld [smem:[#allocation3 + $0x6]]  ;;  %v300_v43 = vld [vmem:[#allocation5 + $0x70] sm:$0xff]  ;;  %v61_v44 = vld [vmem:[#allocation5 + $0x18] sm:$0xff]  ;;  %v377_v48 = vld [vmem:[#allocation5 + $0x80] sm:$0xff] }
  0x12   :  { %s914_s7 = sld [smem:[#allocation3 + $0x7]]  ;;  %v143_v45 = vld [vmem:[#allocation5 + $0x38] sm:$0xff]  ;;  %v456_v49 = vld [vmem:[#allocation5 + $0xa0] sm:$0xff]  ;;  %v378_v52 = vld [vmem:[#allocation5 + $0x88] sm:$0xff] }
  0x13   :  { %s726_s8 = sshll.u32 %s44_s28, 5  ;;  %s916_s9 = sld [smem:[#allocation3 + $0x4]]  ;;  %v222_v46 = vld [vmem:[#allocation5 + $0x58] sm:$0xff]  ;;  %v535_v50 = vld [vmem:[#allocation5 + $0xc0] sm:$0xff]  ;;  %v457_v53 = vld [vmem:[#allocation5 + $0xa8] sm:$0xff] }
  0x14   :  { %s47_s11 = scalar_lea.vmem %s1120_s2, %s726_s8  ;;  %s734_s12 = sshll.u32 %s732_s29, 5  ;;  %v301_v47 = vld [vmem:[#allocation5 + $0x78] sm:$0xff]  ;;  %v614_v51 = vld [vmem:[#allocation5 + $0xe0] sm:$0xff]  ;;  %v536_v54 = vld [vmem:[#allocation5 + $0xc8] sm:$0xff] }
  0x15   :  { %v51_v0 = vld [vmem:[%s47_s11 + $0x18] sm:$0xff]  ;;  %s128_s15 = scalar_lea.vmem %s1120_s2, %s734_s12  ;;  %s742_s16 = sshll.u32 %s740_s30, 5  ;;  %v50_v1 = vld [vmem:[%s47_s11 + $0x10] sm:$0xff]  ;;  %v49_v6 = vld [vmem:[%s47_s11 + $0x8] sm:$0xff] }
  0x16   :  { %87 = vmatpush.msra.mxu0 %v51_v0  ;;  %v132_v2 = vld [vmem:[%s128_s15 + $0x18] sm:$0xff]  ;;  %s207_s19 = scalar_lea.vmem %s1120_s2, %s742_s16  ;;  %s750_s20 = sshll.u32 %s748_s5, 5  ;;  %v131_v3 = vld [vmem:[%s128_s15 + $0x10] sm:$0xff]  ;;  %v130_v9 = vld [vmem:[%s128_s15 + $0x8] sm:$0xff] }
  0x17   :  { %168 = vmatpush.msra.mxu1 %v132_v2  ;;  %v211_v4 = vld [vmem:[%s207_s19 + $0x18] sm:$0xff]  ;;  %s286_s23 = scalar_lea.vmem %s1120_s2, %s750_s20  ;;  %v210_v5 = vld [vmem:[%s207_s19 + $0x10] sm:$0xff]  ;;  %s774_s24 = sshll.u32 %s912_s6, 5  ;;  %v209_v10 = vld [vmem:[%s207_s19 + $0x8] sm:$0xff] }
  0x18   :  { %247 = vmatpush.msra.mxu2 %v211_v4  ;;  %v290_v7 = vld [vmem:[%s286_s23 + $0x18] sm:$0xff]  ;;  %88 = vmatpush.msra.mxu0 %v50_v1  ;;  %v289_v8 = vld [vmem:[%s286_s23 + $0x10] sm:$0xff]  ;;  %s782_s25 = sshll.u32 %s914_s7, 5  ;;  %v48_v11 = vld [vmem:[%s47_s11] sm:$0xff]  ;;  %s933_s26 = sld [smem:[#allocation3 + $0x5]] }
  0x19   :  { %326 = vmatpush.msra.mxu3 %v290_v7  ;;  %169 = vmatpush.msra.mxu1 %v131_v3  ;;  %s758_s0 = sshll.u32 %s916_s9, 5  ;;  %v288_v12 = vld [vmem:[%s286_s23 + $0x8] sm:$0xff]  ;;  %v129_v13 = vld [vmem:[%s128_s15] sm:$0xff]  ;;  %s938_s28 = scalar_lea.vmem %s1120_s2, %s774_s24  ;;  %v379_v56 = vld [vmem:[#allocation5 + $0x90] sm:$0xff] }
  0x1a   :  { %248 = vmatpush.msra.mxu2 %v210_v5  ;;  %89 = vmatpush.msra.mxu0 %v49_v6  ;;  %v208_v14 = vld [vmem:[%s207_s19] sm:$0xff]  ;;  %s943_s5 = scalar_lea.vmem %s1120_s2, %s782_s25  ;;  %s948_s8 = scalar_lea.vmem %s1120_s2, %s758_s0  ;;  %v527_v20 = vld [vmem:[%s938_s28 + $0x18] sm:$0xff]  ;;  %v526_v23 = vld [vmem:[%s938_s28 + $0x10] sm:$0xff] }
  0x1b   :  { %327 = vmatpush.msra.mxu3 %v289_v8  ;;  %170 = vmatpush.msra.mxu1 %v130_v9  ;;  %v287_v16 = vld [vmem:[%s286_s23] sm:$0xff]  ;;  %v606_v21 = vld [vmem:[%s943_s5 + $0x18] sm:$0xff]  ;;  %v605_v24 = vld [vmem:[%s943_s5 + $0x10] sm:$0xff]  ;;  %s45_s12 = sld [smem:[#allocation4]]  ;;  %s684_s0 = sshll.u32 %s1122_s4, 4  ;;  %s685_s0 = int_to_ptr.hbm [resolvable:$true] %s684_s0 }
  0x1c   :  { %249 = vmatpush.msra.mxu2 %v209_v10  ;;  %90 = vmatpush.msra.mxu0 %v48_v11  ;;  %v369_v22 = vld [vmem:[%s948_s8 + $0x18] sm:$0xff]  ;;  %v368_v25 = vld [vmem:[%s948_s8 + $0x10] sm:$0xff]  ;;  %v525_v28 = vld [vmem:[%s938_s28 + $0x8] sm:$0xff]  ;;  %s733_s13 = sld [smem:[#allocation4 + $0x1]] }
  0x1d   :  { %328 = vmatpush.msra.mxu3 %v288_v12  ;;  %171 = vmatpush.msra.mxu1 %v129_v13  ;;  %v604_v30 = vld [vmem:[%s943_s5 + $0x8] sm:$0xff]  ;;  %v524_v36 = vld [vmem:[%s938_s28] sm:$0xff]  ;;  %v458_v57 = vld [vmem:[#allocation5 + $0xb0] sm:$0xff]  ;;  %s741_s14 = sld [smem:[#allocation4 + $0x2]] }
  0x1e   :  { %250 = vmatpush.msra.mxu2 %v208_v14  ;;  %728 = vmatmul.msk.f32.vlgmr.msra.gmra.mxu0 %vm62_vm0, %v58_v15  ;;  %s766_s9 = sshll.u32 %s933_s26, 5  ;;  %v367_v32 = vld [vmem:[%s948_s8 + $0x8] sm:$0xff]  ;;  %v603_v37 = vld [vmem:[%s943_s5] sm:$0xff]  ;;  %v537_v58 = vld [vmem:[#allocation5 + $0xd0] sm:$0xff]  ;;  %s749_s15 = sld [smem:[#allocation4 + $0x3]] }
  0x1f   :  { %329 = vmatpush.msra.mxu3 %v287_v16  ;;  %736 = vmatmul.msk.f32.vlgmr.msra.gmra.mxu1 %vm62_vm0, %v140_v17  ;;  %s444_s11 = scalar_lea.vmem %s1120_s2, %s766_s9  ;;  %v366_v38 = vld [vmem:[%s948_s8] sm:$0xff]  ;;  %v615_v55 = vld [vmem:[#allocation5 + $0xe8] sm:$0xff]  ;;  %v616_v59 = vld [vmem:[#allocation5 + $0xf0] sm:$0xff]  ;;  %s1036_s30 = sld [smem:[#allocation4 + $0x4]] }
  0x20   :  { %744 = vmatmul.msk.f32.vlgmr.msra.gmra.mxu2 %vm62_vm0, %v219_v18  ;;  %752 = vmatmul.msk.f32.vlgmr.msra.gmra.mxu3 %vm62_vm0, %v298_v19  ;;  %v448_v26 = vld [vmem:[%s444_s11 + $0x18] sm:$0xff]  ;;  %v447_v27 = vld [vmem:[%s444_s11 + $0x10] sm:$0xff]  ;;  %v446_v35 = vld [vmem:[%s444_s11 + $0x8] sm:$0xff]  ;;  %s1040_s5 = sld [smem:[#allocation4 + $0x5]] }
  0x21   :  { %563 = vmatpush.msrb.mxu2 %v527_v20  ;;  %642 = vmatpush.msrb.mxu3 %v606_v21  ;;  %v445_v39 = vld [vmem:[%s444_s11] sm:$0xff]  ;;  %v380_v60 = vld [vmem:[#allocation5 + $0x98] sm:$0xff]  ;;  %s727_s16 = sshll.u32 %s45_s12, 5  ;;  %s1042_s6 = sld [smem:[#allocation4 + $0x6]] }
  0x22   :  { %405 = vmatpush.msrb.mxu0 %v369_v22  ;;  %484 = vmatpush.msrb.mxu1 %v448_v26  ;;  %v459_v61 = vld [vmem:[#allocation5 + $0xb8] sm:$0xff]  ;;  %s735_s17 = sshll.u32 %s733_s13, 5  ;;  %s53_s20 = scalar_lea.vmem %s1120_s2, %s727_s16 }
  0x23   :  { %564 = vmatpush.msrb.mxu2 %v526_v23  ;;  %643 = vmatpush.msrb.mxu3 %v605_v24  ;;  %v538_v62 = vld [vmem:[#allocation5 + $0xd8] sm:$0xff]  ;;  %s134_s23 = scalar_lea.vmem %s1120_s2, %s735_s17  ;;  %v55_v6 = vld [vmem:[%s53_s20 + $0x8] sm:$0xff]  ;;  %v54_v8 = vld [vmem:[%s53_s20] sm:$0xff]  ;;  %s743_s24 = sshll.u32 %s741_s14, 5 }
  0x24   :  { %406 = vmatpush.msrb.mxu0 %v368_v25  ;;  %485 = vmatpush.msrb.mxu1 %v447_v27  ;;  %v617_v63 = vld [vmem:[#allocation5 + $0xf8] sm:$0xff]  ;;  %v136_v7 = vld [vmem:[%s134_s23 + $0x8] sm:$0xff]  ;;  %v135_v11 = vld [vmem:[%s134_s23] sm:$0xff]  ;;  %s751_s25 = sshll.u32 %s749_s15, 5  ;;  %s1007_s1 = scalar_lea.vmem %s1120_s2, %s743_s24 }
  0x25   :  { %565 = vmatpush.msrb.mxu2 %v525_v28  ;;  %644 = vmatpush.msrb.mxu3 %v604_v30  ;;  %v56_v12 = vld [vmem:[%s53_s20 + $0x10] sm:$0xff]  ;;  %s1012_s29 = scalar_lea.vmem %s1120_s2, %s751_s25  ;;  %v214_v22 = vld [vmem:[%s1007_s1] sm:$0xff]  ;;  %v215_v25 = vld [vmem:[%s1007_s1 + $0x8] sm:$0xff]  ;;  %s1048_s7 = sld [smem:[#allocation4 + $0x7]] }
  0x26   :  { %729 = vmatmul.msk.f32.gmra.mxu0 %vm62_vm0, %v59_v29  ;;  %486 = vmatpush.msrb.mxu1 %v446_v35  ;;  %v137_v14 = vld [vmem:[%s134_s23 + $0x10] sm:$0xff]  ;;  %v294_v26 = vld [vmem:[%s1012_s29 + $0x8] sm:$0xff]  ;;  %v293_v27 = vld [vmem:[%s1012_s29] sm:$0xff]  ;;  %s759_s8 = sshll.u32 %s1036_s30, 5  ;;  %s767_s9 = sshll.u32 %s1040_s5, 5 }
  0x27   :  { %737 = vmatmul.msk.f32.gmra.mxu1 %vm62_vm0, %v141_v31  ;;  %407 = vmatpush.msrb.mxu0 %v367_v32  ;;  %v57_v28 = vld [vmem:[%s53_s20 + $0x18] sm:$0xff]  ;;  %s1057_s11 = scalar_lea.vmem %s1120_s2, %s759_s8  ;;  %s1062_s14 = scalar_lea.vmem %s1120_s2, %s767_s9 }
  0x28   :  { %745 = vmatmul.msk.f32.gmra.mxu2 %vm62_vm0, %v220_v33  ;;  %753 = vmatmul.msk.f32.gmra.mxu3 %vm62_vm0, %v299_v34  ;;  %v138_v29 = vld [vmem:[%s134_s23 + $0x18] sm:$0xff]  ;;  %v216_v34 = vld [vmem:[%s1007_s1 + $0x10] sm:$0xff]  ;;  %s775_s15 = sshll.u32 %s1042_s6, 5 }
  0x29   :  { %566 = vmatpush.msrb.mxu2 %v524_v36  ;;  %645 = vmatpush.msrb.mxu3 %v603_v37  ;;  %v295_v36 = vld [vmem:[%s1012_s29 + $0x10] sm:$0xff]  ;;  %s1077_s19 = scalar_lea.vmem %s1120_s2, %s775_s15 }
  0x2a   :  { %408 = vmatpush.msrb.mxu0 %v366_v38  ;;  %487 = vmatpush.msrb.mxu1 %v445_v39 }
  0x2b   :  { %s783_s16 = sshll.u32 %s1048_s7, 5 }
  0x2c   :  { %s1082_s22 = scalar_lea.vmem %s1120_s2, %s783_s16  ;;  %s877_s2 = smov [#allocation8]  }
  0x2d   :  { %s682_s23 = sshll.u32 %s877_s2, 4  ;;  %s683_s23 = int_to_ptr.vmem [resolvable:$true] %s682_s23 }
  0x2e   :  { %730 = vmatmul.msk.f32.gmra.mxu0 %vm62_vm0, %v60_v40 }
  0x2f   :  { %738 = vmatmul.msk.f32.gmra.mxu1 %vm62_vm0, %v142_v41 }
  0x30   :  { %746 = vmatmul.msk.f32.gmra.mxu2 %vm62_vm0, %v221_v42  ;;  %754 = vmatmul.msk.f32.gmra.mxu3 %vm62_vm0, %v300_v43 }
  0x36   :  { %731 = vmatmul.msk.f32.gmra.mxu0 %vm62_vm0, %v61_v44 }
  0x37   :  { %739 = vmatmul.msk.f32.gmra.mxu1 %vm62_vm0, %v143_v45 }
  0x38   :  { %747 = vmatmul.msk.f32.gmra.mxu2 %vm62_vm0, %v222_v46  ;;  %755 = vmatmul.msk.f32.gmra.mxu3 %vm62_vm0, %v301_v47 }
  0x3e   :  { %760 = vmatmul.msk.f32.vlgmr.msrb.gmra.mxu0 %vm62_vm0, %v377_v48 }
  0x3f   :  { %768 = vmatmul.msk.f32.vlgmr.msrb.gmra.mxu1 %vm62_vm0, %v456_v49 }
  0x40   :  { %776 = vmatmul.msk.f32.vlgmr.msrb.gmra.mxu2 %vm62_vm0, %v535_v50  ;;  %784 = vmatmul.msk.f32.vlgmr.msrb.gmra.mxu3 %vm62_vm0, %v614_v51 }
  0x46   :  { %761 = vmatmul.msk.f32.gmra.mxu0 %vm62_vm0, %v378_v52 }
  0x47   :  { %769 = vmatmul.msk.f32.gmra.mxu1 %vm62_vm0, %v457_v53 }
  0x48   :  { %777 = vmatmul.msk.f32.gmra.mxu2 %vm62_vm0, %v536_v54  ;;  %785 = vmatmul.msk.f32.gmra.mxu3 %vm62_vm0, %v615_v55 }
  0x4e   :  { %762 = vmatmul.msk.f32.gmra.mxu0 %vm62_vm0, %v379_v56 }
  0x4f   :  { %770 = vmatmul.msk.f32.gmra.mxu1 %vm62_vm0, %v458_v57 }
  0x50   :  { %778 = vmatmul.msk.f32.gmra.mxu2 %vm62_vm0, %v537_v58  ;;  %786 = vmatmul.msk.f32.gmra.mxu3 %vm62_vm0, %v616_v59 }
  0x56   :  { %763 = vmatmul.msk.f32.gmra.mxu0 %vm62_vm0, %v380_v60  ;;  %v217_v60 = vld [vmem:[%s1007_s1 + $0x18] sm:$0xff] }
  0x57   :  { %771 = vmatmul.msk.f32.gmra.mxu1 %vm62_vm0, %v459_v61  ;;  %v296_v61 = vld [vmem:[%s1012_s29 + $0x18] sm:$0xff] }
  0x58   :  { %779 = vmatmul.msk.f32.gmra.mxu2 %vm62_vm0, %v538_v62  ;;  %787 = vmatmul.msk.f32.gmra.mxu3 %vm62_vm0, %v617_v63 }
  0x9b   :  { %v92_v0 = vpop.f32.mrf.mxu0 }
  0x9c   :  { %v173_v1 = vpop.f32.mrf.mxu1  ;;  %v104_v18 = vmul.f32 %v92_v0, %v54_v8 }
  0x9d   :  { %v185_v19 = vmul.f32 %v173_v1, %v135_v11 }
  0x9e   :  { %v109_v30 = vsel %vm108_vm1, %v104_v18, 0.0 }
  0x9f   :  { %v189_v31 = vsel %vm108_vm1, %v185_v19, 0.0 }
  0xa3   :  { %v252_v2 = vpop.f32.mrf.mxu2  ;;  %v331_v3 = vpop.f32.mrf.mxu3 }
  0xa4   :  { %v95_v4 = vpop.f32.mrf.mxu0  ;;  %v176_v5 = vpop.f32.mrf.mxu1  ;;  %v264_v44 = vmul.f32 %v252_v2, %v214_v22  ;;  %v343_v45 = vmul.f32 %v331_v3, %v293_v27 }
  0xa5   :  { %v105_v16 = vmul.f32 %v95_v4, %v55_v6  ;;  %v186_v17 = vmul.f32 %v176_v5, %v136_v7 }
  0xa6   :  { %v268_v58 = vsel %vm108_vm1, %v264_v44, 0.0  ;;  %v347_v59 = vsel %vm108_vm1, %v343_v45, 0.0  ;;  %v372_v44 = vld [vmem:[%s1057_s11] sm:$0xff] }
  0xa7   :  { %v110_v23 = vsel %vm108_vm1, %v105_v16, 0.0  ;;  %v190_v24 = vsel %vm108_vm1, %v186_v17, 0.0 }
  0xa8   :  { %v111_v38 = vadd.f32 %v110_v23, %v109_v30  ;;  %v191_v39 = vadd.f32 %v190_v24, %v189_v31 }
  0xab   :  { %v255_v9 = vpop.f32.mrf.mxu2  ;;  %v334_v10 = vpop.f32.mrf.mxu3 }
  0xac   :  { %v98_v13 = vpop.f32.mrf.mxu0  ;;  %v179_v15 = vpop.f32.mrf.mxu1  ;;  %v265_v40 = vmul.f32 %v255_v9, %v215_v25  ;;  %v344_v41 = vmul.f32 %v334_v10, %v294_v26 }
  0xad   :  { %v106_v20 = vmul.f32 %v98_v13, %v56_v12  ;;  %v187_v21 = vmul.f32 %v179_v15, %v137_v14 }
  0xae   :  { %v269_v54 = vsel %vm108_vm1, %v265_v40, 0.0  ;;  %v348_v55 = vsel %vm108_vm1, %v344_v41, 0.0  ;;  %v373_v40 = vld [vmem:[%s1057_s11 + $0x8] sm:$0xff] }
  0xaf   :  { %v112_v32 = vsel %vm108_vm1, %v106_v20, 0.0  ;;  %v192_v33 = vsel %vm108_vm1, %v187_v21, 0.0  ;;  %v270_v2 = vadd.f32 %v269_v54, %v268_v58  ;;  %v349_v3 = vadd.f32 %v348_v55, %v347_v59  ;;  %v452_v41 = vld [vmem:[%s1062_s14 + $0x8] sm:$0xff]  ;;  %v530_v58 = vld [vmem:[%s1077_s19] sm:$0xff] }
  0xb0   :  { %v113_v48 = vadd.f32 %v112_v32, %v111_v38  ;;  %v193_v49 = vadd.f32 %v192_v33, %v191_v39 }
  0xb3   :  { %v258_v35 = vpop.f32.mrf.mxu2  ;;  %v337_v37 = vpop.f32.mrf.mxu3 }
  0xb4   :  { %v101_v42 = vpop.f32.mrf.mxu0  ;;  %v182_v43 = vpop.f32.mrf.mxu1  ;;  %v266_v50 = vmul.f32 %v258_v35, %v216_v34  ;;  %v345_v51 = vmul.f32 %v337_v37, %v295_v36 }
  0xb5   :  { %v107_v46 = vmul.f32 %v101_v42, %v57_v28  ;;  %v188_v47 = vmul.f32 %v182_v43, %v138_v29 }
  0xb6   :  { %v271_v62 = vsel %vm108_vm1, %v266_v50, 0.0  ;;  %v350_v63 = vsel %vm108_vm1, %v345_v51, 0.0  ;;  %v453_v50 = vld [vmem:[%s1062_s14 + $0x10] sm:$0xff] }
  0xb7   :  { %v114_v52 = vsel %vm108_vm1, %v107_v46, 0.0  ;;  %v194_v53 = vsel %vm108_vm1, %v188_v47, 0.0  ;;  %v272_v12 = vadd.f32 %v271_v62, %v270_v2  ;;  %v351_v13 = vadd.f32 %v350_v63, %v349_v3  ;;  %v451_v47 = vld [vmem:[%s1062_s14] sm:$0xff]  ;;  %v610_v62 = vld [vmem:[%s1082_s22 + $0x8] sm:$0xff] }
  0xb8   :  { %v115_v56 = vadd.f32 %v114_v52, %v113_v48  ;;  %v195_v57 = vadd.f32 %v194_v53, %v193_v49  ;;  %v374_v48 = vld [vmem:[%s1057_s11 + $0x10] sm:$0xff]  ;;  %v609_v63 = vld [vmem:[%s1082_s22] sm:$0xff] }
  0xba   :  { %v116_v0 = vrot.slane %v115_v56, 4  ;;  %v196_v1 = vrot.slane %v195_v57, 4 }
  0xbb   :  { %v261_v4 = vpop.f32.mrf.mxu2  ;;  %v340_v5 = vpop.f32.mrf.mxu3 }
  0xbc   :  { %v117_v6 = vadd.f32 %v116_v0, %v115_v56  ;;  %v197_v7 = vadd.f32 %v196_v1, %v195_v57  ;;  %v267_v8 = vmul.f32 %v261_v4, %v217_v60  ;;  %v346_v9 = vmul.f32 %v340_v5, %v296_v61  ;;  %v410_v10 = vpop.f32.mrf.mxu0  ;;  %v489_v11 = vpop.f32.mrf.mxu1  ;;  %v531_v61 = vld [vmem:[%s1077_s19 + $0x8] sm:$0xff]  ;;  %v375_v0 = vld [vmem:[%s1057_s11 + $0x18] sm:$0xff] }
  0xbd   :  { %v422_v54 = vmul.f32 %v410_v10, %v372_v44  ;;  %v501_v55 = vmul.f32 %v489_v11, %v451_v47  ;;  %v454_v1 = vld [vmem:[%s1062_s14 + $0x18] sm:$0xff] }
  0xbe   :  { %v118_v14 = vrot.slane %v117_v6, 2  ;;  %v198_v15 = vrot.slane %v197_v7, 2  ;;  %v273_v16 = vsel %vm108_vm1, %v267_v8, 0.0  ;;  %v352_v17 = vsel %vm108_vm1, %v346_v9, 0.0  ;;  %v611_v8 = vld [vmem:[%s1082_s22 + $0x10] sm:$0xff] }
  0xbf   :  { %v274_v18 = vadd.f32 %v273_v16, %v272_v12  ;;  %v353_v19 = vadd.f32 %v352_v17, %v351_v13  ;;  %v426_v2 = vsel %vm108_vm1, %v422_v54, 0.0  ;;  %v505_v3 = vsel %vm108_vm1, %v501_v55, 0.0 }
  0xc0   :  { %v119_v20 = vadd.f32 %v118_v14, %v117_v6  ;;  %v199_v21 = vadd.f32 %v198_v15, %v197_v7  ;;  %v532_v6 = vld [vmem:[%s1077_s19 + $0x10] sm:$0xff] }
  0xc1   :  { %v275_v22 = vrot.slane %v274_v18, 4  ;;  %v354_v23 = vrot.slane %v353_v19, 4 }
  0xc2   :  { %v120_v24 = vrot.slane %v119_v20, 1  ;;  %v200_v25 = vrot.slane %v199_v21, 1 }
  0xc3   :  { %v276_v26 = vadd.f32 %v275_v22, %v274_v18  ;;  %v355_v27 = vadd.f32 %v354_v23, %v353_v19  ;;  %v1044_v28 = vpop.f32.mrf.mxu2  ;;  %v1046_v29 = vpop.f32.mrf.mxu3 }
  0xc4   :  { %v121_v30 = vadd.f32 %v120_v24, %v119_v20  ;;  %v201_v31 = vadd.f32 %v200_v25, %v199_v21  ;;  %v413_v32 = vpop.f32.mrf.mxu0  ;;  %v492_v33 = vpop.f32.mrf.mxu1  ;;  %v580_v16 = vmul.f32 %v1044_v28, %v530_v58  ;;  %v659_v17 = vmul.f32 %v1046_v29, %v609_v63 }
  0xc5   :  { %v277_v34 = vrot.slane %v276_v26, 2  ;;  %v356_v35 = vrot.slane %v355_v27, 2  ;;  %v423_v52 = vmul.f32 %v413_v32, %v373_v40  ;;  %v502_v53 = vmul.f32 %v492_v33, %v452_v41  ;;  %v533_v32 = vld [vmem:[%s1077_s19 + $0x18] sm:$0xff] }
  0xc6   :  { %123 = vst.msk [vmem:[#allocation8] sm:$0x1] %vm122_vm2, %v121_v30  ;;  %v663_v29 = vsel %vm108_vm1, %v659_v17, 0.0  ;;  %v612_v33 = vld [vmem:[%s1082_s22 + $0x18] sm:$0xff] }
  0xc7   :  { %202 = vst.msk [vmem:[#allocation8 + $0x1] sm:$0x1] %vm122_vm2, %v201_v31  ;;  %v278_v36 = vadd.f32 %v277_v34, %v276_v26  ;;  %v357_v37 = vadd.f32 %v356_v35, %v355_v27  ;;  %v427_v59 = vsel %vm108_vm1, %v423_v52, 0.0  ;;  %v506_v60 = vsel %vm108_vm1, %v502_v53, 0.0 }
  0xc8   :  { %v428_v10 = vadd.f32 %v427_v59, %v426_v2  ;;  %v507_v11 = vadd.f32 %v506_v60, %v505_v3  ;;  %v584_v31 = vsel %vm108_vm1, %v580_v16, 0.0 }
  0xc9   :  { %v279_v38 = vrot.slane %v278_v36, 1  ;;  %v358_v39 = vrot.slane %v357_v37, 1 }
  0xcb   :  { %v280_v42 = vadd.f32 %v279_v38, %v278_v36  ;;  %v359_v43 = vadd.f32 %v358_v39, %v357_v37  ;;  %v571_v45 = vpop.f32.mrf.mxu2  ;;  %v650_v46 = vpop.f32.mrf.mxu3 }
  0xcc   :  { %v416_v49 = vpop.f32.mrf.mxu0  ;;  %v495_v51 = vpop.f32.mrf.mxu1  ;;  %v581_v12 = vmul.f32 %v571_v45, %v531_v61  ;;  %v660_v13 = vmul.f32 %v650_v46, %v610_v62 }
  0xcd   :  { %281 = vst.msk [vmem:[#allocation8 + $0x2] sm:$0x1] %vm122_vm2, %v280_v42  ;;  %v424_v56 = vmul.f32 %v416_v49, %v374_v48  ;;  %v503_v57 = vmul.f32 %v495_v51, %v453_v50 }
  0xce   :  { %360 = vst.msk [vmem:[#allocation8 + $0x3] sm:$0x1] %vm122_vm2, %v359_v43  ;;  %v585_v26 = vsel %vm108_vm1, %v581_v12, 0.0  ;;  %v664_v27 = vsel %vm108_vm1, %v660_v13, 0.0 }
  0xcf   :  { %v429_v4 = vsel %vm108_vm1, %v424_v56, 0.0  ;;  %v508_v5 = vsel %vm108_vm1, %v503_v57, 0.0  ;;  %v586_v38 = vadd.f32 %v585_v26, %v584_v31  ;;  %v665_v39 = vadd.f32 %v664_v27, %v663_v29 }
  0xd0   :  { %v430_v20 = vadd.f32 %v429_v4, %v428_v10  ;;  %v509_v21 = vadd.f32 %v508_v5, %v507_v11 }
  0xd3   :  { %v574_v7 = vpop.f32.mrf.mxu2  ;;  %v653_v9 = vpop.f32.mrf.mxu3 }
  0xd4   :  { %v419_v14 = vpop.f32.mrf.mxu0  ;;  %v498_v15 = vpop.f32.mrf.mxu1  ;;  %v582_v22 = vmul.f32 %v574_v7, %v532_v6  ;;  %v661_v23 = vmul.f32 %v653_v9, %v611_v8 }
  0xd5   :  { %v425_v18 = vmul.f32 %v419_v14, %v375_v0  ;;  %v504_v19 = vmul.f32 %v498_v15, %v454_v1 }
  0xd6   :  { %v587_v34 = vsel %vm108_vm1, %v582_v22, 0.0  ;;  %v666_v35 = vsel %vm108_vm1, %v661_v23, 0.0 }
  0xd7   :  { %v431_v24 = vsel %vm108_vm1, %v425_v18, 0.0  ;;  %v510_v25 = vsel %vm108_vm1, %v504_v19, 0.0  ;;  %v588_v46 = vadd.f32 %v587_v34, %v586_v38  ;;  %v667_v47 = vadd.f32 %v666_v35, %v665_v39 }
  0xd8   :  { %v432_v30 = vadd.f32 %v431_v24, %v430_v20  ;;  %v511_v28 = vadd.f32 %v510_v25, %v509_v21 }
  0xda   :  { %v433_v36 = vrot.slane %v432_v30, 4  ;;  %v512_v37 = vrot.slane %v511_v28, 4 }
  0xdb   :  { %v577_v40 = vpop.f32.mrf.mxu2  ;;  %v656_v41 = vpop.f32.mrf.mxu3 }
  0xdc   :  { %v434_v42 = vadd.f32 %v433_v36, %v432_v30  ;;  %v513_v43 = vadd.f32 %v512_v37, %v511_v28  ;;  %v583_v44 = vmul.f32 %v577_v40, %v533_v32  ;;  %v662_v45 = vmul.f32 %v656_v41, %v612_v33 }
  0xde   :  { %v435_v48 = vrot.slane %v434_v42, 2  ;;  %v514_v49 = vrot.slane %v513_v43, 2  ;;  %v589_v50 = vsel %vm108_vm1, %v583_v44, 0.0  ;;  %v668_v51 = vsel %vm108_vm1, %v662_v45, 0.0 }
  0xdf   :  { %v590_v52 = vadd.f32 %v589_v50, %v588_v46  ;;  %v669_v53 = vadd.f32 %v668_v51, %v667_v47 }
  0xe0   :  { %v436_v54 = vadd.f32 %v435_v48, %v434_v42  ;;  %v515_v55 = vadd.f32 %v514_v49, %v513_v43 }
  0xe1   :  { %v591_v56 = vrot.slane %v590_v52, 4  ;;  %v670_v57 = vrot.slane %v669_v53, 4 }
  0xe2   :  { %v437_v58 = vrot.slane %v436_v54, 1  ;;  %v516_v59 = vrot.slane %v515_v55, 1 }
  0xe3   :  { %v592_v60 = vadd.f32 %v591_v56, %v590_v52  ;;  %v671_v61 = vadd.f32 %v670_v57, %v669_v53 }
  0xe4   :  { %v438_v62 = vadd.f32 %v437_v58, %v436_v54  ;;  %v517_v63 = vadd.f32 %v516_v59, %v515_v55 }
  0xe5   :  { %v593_v0 = vrot.slane %v592_v60, 2  ;;  %v672_v1 = vrot.slane %v671_v61, 2 }
  0xe6   :  { %439 = vst.msk [vmem:[#allocation8 + $0x4] sm:$0x1] %vm122_vm2, %v438_v62 }
  0xe7   :  { %518 = vst.msk [vmem:[#allocation8 + $0x5] sm:$0x1] %vm122_vm2, %v517_v63  ;;  %v594_v2 = vadd.f32 %v593_v0, %v592_v60  ;;  %v673_v3 = vadd.f32 %v672_v1, %v671_v61 }
  0xe9   :  { %v595_v4 = vrot.slane %v594_v2, 1  ;;  %v674_v5 = vrot.slane %v673_v3, 1 }
  0xeb   :  { %v596_v6 = vadd.f32 %v595_v4, %v594_v2  ;;  %v675_v7 = vadd.f32 %v674_v5, %v673_v3 }
  0xed   :  { %597 = vst.msk [vmem:[#allocation8 + $0x6] sm:$0x1] %vm122_vm2, %v596_v6 }
  0xee   :  { %676 = vst.msk [vmem:[#allocation8 + $0x7] sm:$0x1] %vm122_vm2, %v675_v7 }
  0xef   :  { %687 = dma.vmem_to_hbm [thread:$0]  %s683_s23, 128, %s685_s0, [#allocation7]  }
  0xf0   :  { %870 = dma.done.wait [#allocation7], 128  }
  0xf1   :  { %871 = vsyncadd [#allocation7], 4294967168 }
  0xf2   :  { %692 = vsyncpa [#allocation6], 1 }
  0xf3   :  { %693 = vsyncpa [#allocation7], 1 }

</bundles_post_ra>
